<compile_context>
chip_gen: v6e
topology: v6e:2x2x1
jax: 0.10.0
libtpu: 0.0.40
codegen_flags: <defaults>
</compile_context>

<pallas_src>
import jax
import jax.numpy as jnp
import numpy as np
from jax.experimental import pallas as pl
from jax.experimental.pallas import tpu as pltpu


def grid_forward_kernel(aT_ref, gT_ref,
                        w1_ref, b1_ref, w2_ref, b2_ref, w3d_ref, b3d_ref,
                        out_ref):
    # Feature-major tiles: aT [A, TB], gT [G, TB]; weights PyTorch-oriented [out, in].
    aT = aT_ref[...]                              # f32 [A, TB]
    gT = gT_ref[...]                              # f32 [G, TB]

    # a2trans_layer (diagonal-folded): bf16 MXU inputs, f32 accumulation,
    # f32 bias-add / relu epilogues.
    h = jnp.dot(w1_ref[...], aT.astype(jnp.bfloat16),
                preferred_element_type=jnp.float32) + b1_ref[...]      # [H, TB]
    h = jnp.maximum(h, 0.0)
    h = jnp.dot(w2_ref[...], h.astype(jnp.bfloat16),
                preferred_element_type=jnp.float32) + b2_ref[...]      # [H, TB]
    h = jnp.maximum(h, 0.0)
    diag = jnp.dot(w3d_ref[...], h.astype(jnp.bfloat16),
                   preferred_element_type=jnp.float32) + b3d_ref[...]  # [G, TB]
    diag = jnp.maximum(diag, 0.0)   # == diagonal of relu(W_trans), exactly

    # einsum('bgg,bg->bg') == diag * prev_g (elementwise), then norm_g.
    new_g = jnp.maximum(diag * gT, 0.0)           # relu kept for generic prev_g
    denom = jnp.sum(new_g, axis=0, keepdims=True) + 1e-8               # [1, TB]
    out_ref[...] = (new_g * pl.reciprocal(denom, approx=True)).astype(out_ref.dtype)


def grid_module_forward(prev_g, prev_a, params, *, tile_b=128):
    B, G = prev_g.shape
    A = prev_a.shape[-1]
    H = params["w1"].shape[0]
    if B % tile_b != 0:
        tile_b = B                    # single full-array tile fallback

    # Layout plumbing: present feature-major (lane = batch) slabs to the kernel.
    aT = prev_a.T.astype(jnp.float32)             # [A, B]
    gT = prev_g.T.astype(jnp.float32)             # [G, B]
    nb = B // tile_b

    weight_bytes = 2 * (H * A + H * H + G * H) + 4 * (2 * H + G)
    act_bytes = 4 * B * (A + 2 * G)
    cost = pl.CostEstimate(
        flops=2 * B * (A * H + H * H + H * G),
        transcendentals=B,
        bytes_accessed=weight_bytes + act_bytes,
    )

    outT = pl.pallas_call(
        grid_forward_kernel,
        out_shape=jax.ShapeDtypeStruct((G, B), jnp.float32),
        grid_spec=pltpu.PrefetchScalarGridSpec(
            num_scalar_prefetch=0,
            grid=(nb,),
            in_specs=[
                pl.BlockSpec((A, tile_b), lambda i: (0, i)),   # prev_a^T tile
                pl.BlockSpec((G, tile_b), lambda i: (0, i)),   # prev_g^T tile
                pl.BlockSpec((H, A), lambda i: (0, 0)),        # w1 (resident)
                pl.BlockSpec((H, 1), lambda i: (0, 0)),        # b1
                pl.BlockSpec((H, H), lambda i: (0, 0)),        # w2 (resident)
                pl.BlockSpec((H, 1), lambda i: (0, 0)),        # b2
                pl.BlockSpec((G, H), lambda i: (0, 0)),        # w3_diag (resident)
                pl.BlockSpec((G, 1), lambda i: (0, 0)),        # b3_diag
            ],
            out_specs=pl.BlockSpec((G, tile_b), lambda i: (0, i)),
        ),
        compiler_params=pltpu.CompilerParams(
            dimension_semantics=("parallel",)),                # 2 TCs on v7x
        cost_estimate=cost,
    )(aT, gT,
      params["w1"], params["b1"],
      params["w2"], params["b2"],
      params["w3_diag"], params["b3_diag"])

    return outT.T                                              # [B, G]


def xavier_uniform(key, out_f, in_f):
    bound = float(np.sqrt(6.0 / (in_f + out_f)))
    # PyTorch nn.Linear orientation: [out_features, in_features]
    return jax.random.uniform(key, (out_f, in_f), jnp.float32, -bound, bound)


def make_params(key, action_dim, g_size, expand_factor=3):
    H = g_size * expand_factor
    G2 = g_size * g_size
    k1, k2, k3 = jax.random.split(key, 3)
    w1 = xavier_uniform(k1, H, action_dim)
    w2 = xavier_uniform(k2, H, H)
    w3 = xavier_uniform(k3, G2, H)        # full layer-3 (Xavier bound uses G*G fan-out)
    # Offline diagonal fold: only rows arange(G)*G + arange(G) of w3 are ever used.
    idx = jnp.arange(g_size) * g_size + jnp.arange(g_size)
    w3_diag = w3[idx, :]                  # [G, H]
    return {
        "w1": w1.astype(jnp.bfloat16), "b1": jnp.zeros((H, 1), jnp.float32),
        "w2": w2.astype(jnp.bfloat16), "b2": jnp.zeros((H, 1), jnp.float32),
        "w3_diag": w3_diag.astype(jnp.bfloat16),
        "b3_diag": jnp.zeros((g_size, 1), jnp.float32),
        # reference-only copies (to validate the folding end-to-end):
        "w3_full": w3.astype(jnp.bfloat16),
        "b3_full": jnp.zeros((G2, 1), jnp.float32),
    }


def reference_forward(prev_g, prev_a, params, g_size):
    # Pure-JAX reference mirroring the PyTorch forward, including the FULL
    # layer-3 + einsum-diagonal path (no folding), with the same bf16 matmul
    # inputs / f32 accumulation as the kernel.
    def lin_relu(x, w_bf16, b):
        y = jnp.dot(x.astype(jnp.bfloat16), w_bf16.T,
                    preferred_element_type=jnp.float32) + b.T
        return jax.nn.relu(y)

    h = lin_relu(prev_a, params["w1"], params["b1"])
    h = lin_relu(h, params["w2"], params["b2"])
    wflat = lin_relu(h, params["w3_full"], params["b3_full"])      # [B, G*G]
    W = wflat.reshape(prev_g.shape[0], g_size, g_size)
    new_g = jnp.einsum("bgg,bg->bg", W, prev_g)                    # diagonal * g
    new_g = jax.nn.relu(new_g)
    return new_g / (jnp.sum(new_g, axis=-1, keepdims=True) + 1e-8)


if __name__ == "__main__":
    key = jax.random.PRNGKey(0)
    B, action_dim, g_size = 256, 4, 16    # batched (amortizes dispatch), 2 grid tiles

    kp, kg, ka = jax.random.split(key, 3)
    params = make_params(kp, action_dim, g_size)

    prev_g = jax.nn.relu(jax.random.normal(kg, (B, g_size), jnp.float32))
    prev_g = prev_g / (jnp.sum(prev_g, axis=-1, keepdims=True) + 1e-8)
    prev_a = jax.random.normal(ka, (B, action_dim), jnp.float32)

    out = grid_module_forward(prev_g, prev_a, params, tile_b=128)
    out = jax.block_until_ready(out)

    ref = reference_forward(prev_g, prev_a, params, g_size)
    np.testing.assert_allclose(np.asarray(out), np.asarray(ref), rtol=1e-2, atol=1e-4)

    print("KERNEL_OK")
</pallas_src>

<mosaic_0001>
module attributes {stable_mosaic.version = 11 : i64} {
  func.func @grid_forward_kernel(%arg0: i32, %arg1: memref<4x128xf32, #tpu.memory_space<vmem>>, %arg2: memref<16x128xf32, #tpu.memory_space<vmem>>, %arg3: memref<48x4xbf16, #tpu.memory_space<vmem>>, %arg4: memref<48x1xf32, #tpu.memory_space<vmem>>, %arg5: memref<48x48xbf16, #tpu.memory_space<vmem>>, %arg6: memref<48x1xf32, #tpu.memory_space<vmem>>, %arg7: memref<16x48xbf16, #tpu.memory_space<vmem>>, %arg8: memref<16x1xf32, #tpu.memory_space<vmem>>, %arg9: memref<16x128xf32, #tpu.memory_space<vmem>>) attributes {dimension_semantics = [#tpu.dimension_semantics<parallel>], iteration_bounds = array<i64: 2>, scalar_prefetch = 0 : i64, scratch_operands = 0 : i64, tpu.core_type = #tpu.core_type<tc>, window_params = [{transform_indices = @transform_0, window_bounds = array<i64: 4, 128>}, {transform_indices = @transform_1, window_bounds = array<i64: 16, 128>}, {pipeline_mode = #tpu.pipeline_mode<synchronous>, transform_indices = @transform_2, window_bounds = array<i64: 48, 4>}, {pipeline_mode = #tpu.pipeline_mode<synchronous>, transform_indices = @transform_3, window_bounds = array<i64: 48, 1>}, {pipeline_mode = #tpu.pipeline_mode<synchronous>, transform_indices = @transform_4, window_bounds = array<i64: 48, 48>}, {pipeline_mode = #tpu.pipeline_mode<synchronous>, transform_indices = @transform_5, window_bounds = array<i64: 48, 1>}, {pipeline_mode = #tpu.pipeline_mode<synchronous>, transform_indices = @transform_6, window_bounds = array<i64: 16, 48>}, {pipeline_mode = #tpu.pipeline_mode<synchronous>, transform_indices = @transform_7, window_bounds = array<i64: 16, 1>}, {transform_indices = @transform_8, window_bounds = array<i64: 16, 128>}]} {
    %c0 = arith.constant 0 : index
    %c0_0 = arith.constant 0 : index
    %0 = vector.load %arg1[%c0, %c0_0] : memref<4x128xf32, #tpu.memory_space<vmem>>, vector<4x128xf32>
    %c0_1 = arith.constant 0 : index
    %c0_2 = arith.constant 0 : index
    %1 = vector.load %arg2[%c0_1, %c0_2] : memref<16x128xf32, #tpu.memory_space<vmem>>, vector<16x128xf32>
    %c0_3 = arith.constant 0 : index
    %c0_4 = arith.constant 0 : index
    %2 = vector.load %arg3[%c0_3, %c0_4] : memref<48x4xbf16, #tpu.memory_space<vmem>>, vector<48x4xbf16>
    %3 = arith.truncf %0 : vector<4x128xf32> to vector<4x128xbf16>
    %cst = arith.constant dense<0.000000e+00> : vector<48x128xf32>
    %4 = tpu.matmul %2, %3, %cst {dimension_numbers = #tpu.dot_dimension_numbers<[1], [0], [0], [1], [0, 0, 1, 1], [], []>} : vector<48x4xbf16>, vector<4x128xbf16>, vector<48x128xf32> -> vector<48x128xf32>
    %c0_5 = arith.constant 0 : index
    %c0_6 = arith.constant 0 : index
    %5 = vector.load %arg4[%c0_5, %c0_6] : memref<48x1xf32, #tpu.memory_space<vmem>>, vector<48x1xf32>
    %6 = vector.broadcast %5 : vector<48x1xf32> to vector<48x128xf32>
    %7 = arith.addf %4, %6 : vector<48x128xf32>
    %cst_7 = arith.constant 0.000000e+00 : f32
    %8 = vector.broadcast %cst_7 : f32 to vector<48x128xf32>
    %9 = arith.maximumf %7, %8 : vector<48x128xf32>
    %c0_8 = arith.constant 0 : index
    %c0_9 = arith.constant 0 : index
    %10 = vector.load %arg5[%c0_8, %c0_9] : memref<48x48xbf16, #tpu.memory_space<vmem>>, vector<48x48xbf16>
    %11 = arith.truncf %9 : vector<48x128xf32> to vector<48x128xbf16>
    %cst_10 = arith.constant dense<0.000000e+00> : vector<48x128xf32>
    %12 = tpu.matmul %10, %11, %cst_10 {dimension_numbers = #tpu.dot_dimension_numbers<[1], [0], [0], [1], [0, 0, 1, 1], [], []>} : vector<48x48xbf16>, vector<48x128xbf16>, vector<48x128xf32> -> vector<48x128xf32>
    %c0_11 = arith.constant 0 : index
    %c0_12 = arith.constant 0 : index
    %13 = vector.load %arg6[%c0_11, %c0_12] : memref<48x1xf32, #tpu.memory_space<vmem>>, vector<48x1xf32>
    %14 = vector.broadcast %13 : vector<48x1xf32> to vector<48x128xf32>
    %15 = arith.addf %12, %14 : vector<48x128xf32>
    %cst_13 = arith.constant 0.000000e+00 : f32
    %16 = vector.broadcast %cst_13 : f32 to vector<48x128xf32>
    %17 = arith.maximumf %15, %16 : vector<48x128xf32>
    %c0_14 = arith.constant 0 : index
    %c0_15 = arith.constant 0 : index
    %18 = vector.load %arg7[%c0_14, %c0_15] : memref<16x48xbf16, #tpu.memory_space<vmem>>, vector<16x48xbf16>
    %19 = arith.truncf %17 : vector<48x128xf32> to vector<48x128xbf16>
    %cst_16 = arith.constant dense<0.000000e+00> : vector<16x128xf32>
    %20 = tpu.matmul %18, %19, %cst_16 {dimension_numbers = #tpu.dot_dimension_numbers<[1], [0], [0], [1], [0, 0, 1, 1], [], []>} : vector<16x48xbf16>, vector<48x128xbf16>, vector<16x128xf32> -> vector<16x128xf32>
    %c0_17 = arith.constant 0 : index
    %c0_18 = arith.constant 0 : index
    %21 = vector.load %arg8[%c0_17, %c0_18] : memref<16x1xf32, #tpu.memory_space<vmem>>, vector<16x1xf32>
    %22 = vector.broadcast %21 : vector<16x1xf32> to vector<16x128xf32>
    %23 = arith.addf %20, %22 : vector<16x128xf32>
    %cst_19 = arith.constant 0.000000e+00 : f32
    %24 = vector.broadcast %cst_19 : f32 to vector<16x128xf32>
    %25 = arith.maximumf %23, %24 : vector<16x128xf32>
    %26 = arith.mulf %25, %1 : vector<16x128xf32>
    %cst_20 = arith.constant 0.000000e+00 : f32
    %27 = vector.broadcast %cst_20 : f32 to vector<16x128xf32>
    %28 = arith.maximumf %26, %27 : vector<16x128xf32>
    %cst_21 = arith.constant dense<0.000000e+00> : vector<128xf32>
    %29 = vector.multi_reduction <add>, %28, %cst_21 [0] : vector<16x128xf32> to vector<128xf32>
    %30 = vector.shape_cast %29 : vector<128xf32> to vector<1x128xf32>
    %cst_22 = arith.constant 9.99999993E-9 : f32
    %31 = vector.broadcast %cst_22 : f32 to vector<1x128xf32>
    %32 = arith.addf %30, %31 : vector<1x128xf32>
    %33 = tpu.reciprocal %32 {approx = true} : vector<1x128xf32> -> vector<1x128xf32>
    %34 = vector.broadcast %33 : vector<1x128xf32> to vector<16x128xf32>
    %35 = arith.mulf %28, %34 : vector<16x128xf32>
    %c0_23 = arith.constant 0 : index
    %c0_24 = arith.constant 0 : index
    %36 = vector.load %arg9[%c0_23, %c0_24] : memref<16x128xf32, #tpu.memory_space<vmem>>, vector<16x128xf32>
    tpu.vector_store %arg9[%c0_23, %c0_24], %35 {strides = array<i32>} : memref<16x128xf32, #tpu.memory_space<vmem>>, vector<16x128xf32>,
    return
  }
  func.func @transform_0(%arg0: i32) -> (i32, i32) {
    %c0_i32 = arith.constant 0 : i32
    %c0_i32_0 = arith.constant 0 : i32
    return %c0_i32, %arg0 : i32, i32
  }
  func.func @transform_1(%arg0: i32) -> (i32, i32) {
    %c0_i32 = arith.constant 0 : i32
    %c0_i32_0 = arith.constant 0 : i32
    return %c0_i32, %arg0 : i32, i32
  }
  func.func @transform_2(%arg0: i32) -> (i32, i32) {
    %c0_i32 = arith.constant 0 : i32
    %c0_i32_0 = arith.constant 0 : i32
    %c0_i32_1 = arith.constant 0 : i32
    return %c0_i32, %c0_i32_0 : i32, i32
  }
  func.func @transform_3(%arg0: i32) -> (i32, i32) {
    %c0_i32 = arith.constant 0 : i32
    %c0_i32_0 = arith.constant 0 : i32
    %c0_i32_1 = arith.constant 0 : i32
    return %c0_i32, %c0_i32_0 : i32, i32
  }
  func.func @transform_4(%arg0: i32) -> (i32, i32) {
    %c0_i32 = arith.constant 0 : i32
    %c0_i32_0 = arith.constant 0 : i32
    %c0_i32_1 = arith.constant 0 : i32
    return %c0_i32, %c0_i32_0 : i32, i32
  }
  func.func @transform_5(%arg0: i32) -> (i32, i32) {
    %c0_i32 = arith.constant 0 : i32
    %c0_i32_0 = arith.constant 0 : i32
    %c0_i32_1 = arith.constant 0 : i32
    return %c0_i32, %c0_i32_0 : i32, i32
  }
  func.func @transform_6(%arg0: i32) -> (i32, i32) {
    %c0_i32 = arith.constant 0 : i32
    %c0_i32_0 = arith.constant 0 : i32
    %c0_i32_1 = arith.constant 0 : i32
    return %c0_i32, %c0_i32_0 : i32, i32
  }
  func.func @transform_7(%arg0: i32) -> (i32, i32) {
    %c0_i32 = arith.constant 0 : i32
    %c0_i32_0 = arith.constant 0 : i32
    %c0_i32_1 = arith.constant 0 : i32
    return %c0_i32, %c0_i32_0 : i32, i32
  }
  func.func @transform_8(%arg0: i32) -> (i32, i32) {
    %c0_i32 = arith.constant 0 : i32
    %c0_i32_0 = arith.constant 0 : i32
    return %c0_i32, %arg0 : i32, i32
  }
}

</mosaic_0001>

<bundles_post_ra>
// kernel: tpu_custom_call.1
= control target key start
LH: loop header
LB: loop body
LE: loop exit
PB: predicated region body
PF: predicated region fallthrough
CT: control target
= control target key end

     0   :  { %13 = vsyncpa [#allocation4], 0  ;;  %s1270_s0 = inlined_call_operand.vmem [shape: f32[4,256], index: 0, kind: input, shape index: {}]   ;;  %s1271_s1 = inlined_call_operand.vmem [shape: f32[16,256], index: 1, kind: input, shape index: {}]   ;;  %s1272_s2 = inlined_call_operand.vmem [shape: bf16[48,4], index: 2, kind: input, shape index: {}]   ;;  %s1273_s3 = inlined_call_operand.vmem [shape: f32[48,1], index: 3, kind: input, shape index: {}]   ;;  %s1274_s4 = inlined_call_operand.vmem [shape: bf16[48,48], index: 4, kind: input, shape index: {}]   ;;  %s1275_s5 = inlined_call_operand.vmem [shape: f32[48,1], index: 5, kind: input, shape index: {}]   ;;  %s1276_s6 = inlined_call_operand.vmem [shape: bf16[16,48], index: 6, kind: input, shape index: {}]   ;;  %s1277_s7 = inlined_call_operand.vmem [shape: f32[16,1], index: 7, kind: input, shape index: {}]   ;;  %s1278_s8 = inlined_call_operand.hbm [shape: f32[16,256], index: 8, kind: output, shape index: {}]  }
   0x1   :  { %15 = vsyncpa [#allocation4 + $0x1], 0  ;;  %s1063_s27 = smov 0   ;;  %s1065_s28 = smov 0  }
   0x2   :  { %s1067_s29 = smov 0   ;;  %s1069_s30 = smov 0  }
   0x3 LB: > { %s1084_s9 = sadd.s32 4294967295, %s1009_s30   ;;  %s810_s10 = sadd.s32 4294967294, %s1009_s30   ;;  %s1009_s30 = sphi %s1069_s30, %s1284_s30   ;;  %s1005_s29 = sphi %s1067_s29, %s1283_s29   ;;  %s1001_s28 = sphi %s1065_s28, %s1282_s28   ;;  %s997_s27 = sphi %s1063_s27, %s1281_s27  }
   0x4   : > { %s1088_s11 = sadd.s32 1, %s1009_s30   ;;  %s54_s12 = sadd.s32 1, %s1005_s29 }
   0x5   : > { %s51_s13 = ssub.s32 %s1009_s30, %s1088_s11  ;;  %p61_p0 = scmp.ne.s32.totalorder %s1005_s29, %s1001_s28 }
   0x6   : > { %p52_p1 = scmp.eq.s32.totalorder %s51_s13, 0  ;;  %p62_p2 = scmp.eq.s32.totalorder %s1009_s30, 0 }
   0x7   : > { %p217_p3 = scmp.eq.s32.totalorder %s1084_s9, 1  ;;  %p222_p4 = scmp.ne.s32.totalorder %s1001_s28, %s997_s27 }
   0x8   : > { %s1100_s14 = scalar_select %p52_p1, %s1005_s29, %s54_s12  }
   0x9   : > { %p63_p5 = por %p62_p2, %p61_p0  ;;  %p1102_p6 = por %p217_p3, %p61_p0 }
   0xa   : > { %p223_p7 = scmp.eq.s32.totalorder %s810_s10, 1  ;;  %p812_p9 = scmp.ge.s32.totalorder %s1009_s30, 2 }
   0xc   : > { %p1106_p8 = por %p223_p7, %p222_p4  ;;  %257 = sbr.rel (%p812_p9) target bundleno = 22 (0x16), region = 40 }
  0x11   : > { %267 = sbr.rel (!%p63_p5) target bundleno = 22 (0x16), region = 48  ;;  %s269_s17 = sand.u32 (%p63_p5), 1, %s1005_s29  }
  0x12   : > { %s814_s18 = sshll.u32 (%p63_p5), %s1009_s30, 3  ;;  %s813_s19 = sshll.u32 (%p63_p5), %s269_s17, 4 }
  0x13   : > { %s273_s22 = scalar_lea.vmem (%p63_p5), %s1271_s1, %s814_s18  ;;  %s271_s23 = scalar_lea.vmem (%p63_p5), [#allocation2], %s813_s19 }
  0x14   : > { %v304_v0 = vld [vmem:[%s273_s22] sm:$0xff] (%p63_p5)  ;;  %v306_v1 = vld [vmem:[%s273_s22 + $0x10] sm:$0xff] (%p63_p5) }
  0x15   : > { %305 = vst [vmem:[%s271_s23] sm:$0xff] (%p63_p5), %v304_v0  ;;  %307 = vst [vmem:[%s271_s23 + $0x8] sm:$0xff] (%p63_p5), %v306_v1 }
  0x16 PF: > { %p815_p10 = scmp.ge.s32.totalorder %s1009_s30, 1  ;;  %p312_p11 = scmp.lt.s32.totalorder %s1009_s30, 3 }
  0x18   : > { %p313_p12 = pnand %p815_p10, %p312_p11 }
  0x19   : > { %p356_p13 = scmp.lt.s32.totalorder (!%p313_p12), %s1084_s9, 1 }
  0x1a   : > { %316 = sbr.rel (%p313_p12) target bundleno = 755 (0x2f3), region = 86 }
  0x1f   : > { %v1011_v2 = vmov 0.0   ;;  %vm1012_vm0 = vmmov 0   ;;  %s357_s24 = scalar_select %p356_p13, %s1084_s9, 1  ;;  %v375_v3 = vld [vmem:[%s1273_s3 + $0x20] sm:$0xff]  ;;  %v1013_v4 = vmov 0   ;;  %v373_v5 = vld [vmem:[%s1273_s3 + $0x10] sm:$0xff] }
  0x20   : > { %851 = vmatprep.subr.bf16.mxu0 %v1011_v2  ;;  %853 = vmatprep.mubr.msk.bf16.mxu0 %vm1012_vm0, %v1011_v2  ;;  %vm432_vm1 = vcmask 1041408   ;;  %v376_v7 = vld [vmem:[%s1273_s3 + $0x28] sm:$0xff]  ;;  %v374_v8 = vld [vmem:[%s1273_s3 + $0x18] sm:$0xff]  ;;  %v940_v10 = vld [vmem:[%s1272_s2] sm:$0xff]   ;;  %vm422_vm2 = vcmask 31744   ;;  %vm559_vm3 = vcmask 392192  }
  0x21   : > { %865 = vmatprep.subr.bf16.mxu1 %v1011_v2  ;;  %871 = vmatprep.mubr.msk.bf16.mxu1 %vm1012_vm0, %v1011_v2  ;;  %s818_s10 = sshll.u32 %s357_s24, 2  ;;  %v371_v12 = vld [vmem:[%s1273_s3] sm:$0xff]  ;;  %v372_v13 = vld [vmem:[%s1273_s3 + $0x8] sm:$0xff]  ;;  %v510_v17 = vld [vmem:[%s1275_s5 + $0x10] sm:$0xff]  ;;  %s834_s24 = sshll.u32 %s1084_s9, 7 }
  0x22   : > { %938 = vset.pattern.permute.xlu0 %v1013_v4  ;;  %939 = vset.pattern.permute.xlu1 %v1013_v4  ;;  %s359_s19 = scalar_lea.vmem %s1270_s0, %s818_s10  ;;  %v512_v14 = vld [vmem:[%s1275_s5 + $0x20] sm:$0xff]  ;;  %v513_v15 = vld [vmem:[%s1275_s5 + $0x28] sm:$0xff]  ;;  %v511_v18 = vld [vmem:[%s1275_s5 + $0x18] sm:$0xff]  ;;  %s1225_s10 = scalar_lea.hbm %s1278_s8, %s834_s24 }
  0x23   : > { %399 = vperm.xlu0 %938, %v375_v3   ;;  %389 = vperm.xlu1 %939, %v373_v5   ;;  %v361_v6 = vld [vmem:[%s359_s19] sm:$0xf]  ;;  %v941_v16 = vld [vmem:[%s1272_s2 + $0x8] sm:$0xff]   ;;  %v942_v21 = vld [vmem:[%s1272_s2 + $0x10] sm:$0xff]   ;;  %s319_s19 = sand.u32 1, %s1001_s28   ;;  %s1014_s9 = smov [#allocation3]  }
  0x24   : > { %v370_v9 = vpack.c.bf16 %v361_v6, %v361_v6  ;;  %v508_v19 = vld [vmem:[%s1275_s5] sm:$0xff]  ;;  %v509_v20 = vld [vmem:[%s1275_s5 + $0x8] sm:$0xff]  ;;  %v945_v59 = vld [vmem:[%s1274_s4 + $0x10] sm:$0xff]   ;;  %s816_s20 = sshll.u32 %s319_s19, 4  ;;  %s1229_s12 = scalar_lea.sflag [#allocation4], %s319_s19 }
  0x25   : > { %v637_v22 = vld [vmem:[%s1277_s7] sm:$0xff]  ;;  %v638_v23 = vld [vmem:[%s1277_s7 + $0x8] sm:$0xff]  ;;  %s321_s21 = scalar_lea.vmem [#allocation2], %s816_s20  ;;  %s355_s22 = scalar_lea.vmem [#allocation3], %s816_s20 }
  0x26   : > { %v434_v11 = vsel %vm432_vm1, %v370_v9, 0  ;;  %v943_v57 = vld [vmem:[%s1274_s4] sm:$0xff]   ;;  %v944_v58 = vld [vmem:[%s1274_s4 + $0x8] sm:$0xff]   ;;  %s730_s23 = sshll.u32 %s355_s22, 4  ;;  %s953_s17 = sshll.u32 %s1014_s9, 4  ;;  %s1220_s23 = int_to_ptr.vmem [resolvable:$true] %s730_s23  ;;  %s954_s17 = int_to_ptr.vmem [resolvable:$false] %s953_s17 }
  0x27   : > { %404 = vperm.xlu0 %938, %v376_v7   ;;  %394 = vperm.xlu1 %939, %v374_v8   ;;  %s949_s13 = scalar_lea.vmem %s1220_s23, 256  ;;  %s955_s18 = scalar_lea.vmem %s954_s17, 512 }
  0x28   : > { %852 = vmatpush3.bf16.msra.mxu0 %v434_v11  ;;  %p950_p0 = scmp.ne.s32.totalorder %s1220_s23, %s949_s13  ;;  %p956_p3 = scmp.lt.s32.totalorder %s1220_s23, %s954_s17 }
  0x29   : > { %883 = vmatprep.subr.bf16.mxu0 %v1011_v2  ;;  %p957_p4 = scmp.lt.s32.totalorder %s955_s18, %s949_s13 }
  0x2a   : > { %p951_p1 = pnand %p950_p0, %p1102_p6 }
  0x2b   : > { %854 = vmatmul.mubr.msk.bf16.vlgmr.msra.gmra.mxu0 %vm422_vm2, %v940_v10  ;;  %379 = vperm.xlu0 %938, %v371_v12   ;;  %p958_p5 = por %p957_p4, %p956_p3 }
  0x2c   : > { %857 = vmatprep.mubr.msk.bf16.mxu0 %vm1012_vm0, %v1011_v2  ;;  %384 = vperm.xlu1 %939, %v372_v13   ;;  %p952_p2 = pneg %p951_p1 }
  0x2e   : > { %p959_p7 = pnand %p958_p5, %p952_p2 }
  0x2f   : > { %536 = vperm.xlu0 %938, %v512_v14  }
  0x30   : > { %541 = vperm.xlu1 %939, %v513_v15  }
  0x33   : > { %858 = vmatmul.mubr.msk.bf16.gmra.mxu0 %vm422_vm2, %v941_v16  ;;  %526 = vperm.xlu0 %938, %v510_v17  }
  0x34   : > { %861 = vmatprep.mubr.msk.bf16.mxu0 %vm1012_vm0, %v1011_v2  ;;  %531 = vperm.xlu1 %939, %v511_v18  }
  0x37   : > { %516 = vperm.xlu0 %938, %v508_v19  }
  0x38   : > { %521 = vperm.xlu1 %939, %v509_v20  }
  0x3b   : > { %862 = vmatmul.mubr.msk.bf16.gmra.mxu0 %vm422_vm2, %v942_v21  ;;  %641 = vperm.xlu0 %938, %v637_v22  }
  0x3c   : > { %646 = vperm.xlu1 %939, %v638_v23   ;;  %889 = vmatprep.mubr.msk.bf16.mxu0 %vm1012_vm0, %v1011_v2 }
  0x9e   : > { %v390_v29 = vpop.permute.xlu1 %389  ;;  %v400_v31 = vpop.permute.xlu0 %399 }
  0xa2   : > { %v395_v34 = vpop.permute.xlu1 %394  ;;  %v405_v36 = vpop.permute.xlu0 %404 }
  0xa6   : > { %v380_v47 = vpop.permute.xlu0 %379 }
  0xa7   : > { %v385_v42 = vpop.permute.xlu1 %384 }
  0xaa   : > { %v537_v5 = vpop.permute.xlu0 %536 }
  0xab   : > { %v542_v3 = vpop.permute.xlu1 %541 }
  0xae   : > { %v527_v11 = vpop.permute.xlu0 %526 }
  0xaf   : > { %v532_v8 = vpop.permute.xlu1 %531 }
  0xb2   : > { %v517_v23 = vpop.permute.xlu0 %516 }
  0xb3   : > { %v522_v19 = vpop.permute.xlu1 %521 }
  0xeb   : > { %v470_v24 = vpop.f32.mrf.mxu0 }
  0xec   : > { %v471_v51 = vadd.f32 %v470_v24, %v380_v47 }
  0xed   : > { %v855_v25 = vpop.f32.mrf.mxu0 }
  0xee   : > { %v493_v55 = vmax.f32 %v471_v51, 0.0 }
  0xef   : > { %v473_v26 = vpop.f32.mrf.mxu0 }
  0xf0   : > { %v474_v48 = vadd.f32 %v473_v26, %v385_v42 }
  0xf1   : > { %v856_v27 = vpop.f32.mrf.mxu0 }
  0xf2   : > { %v494_v53 = vmax.f32 %v474_v48, 0.0 }
  0xf3   : > { %v478_v28 = vpop.f32.mrf.mxu0 }
  0xf4   : > { %v479_v44 = vadd.f32 %v478_v28, %v390_v29  ;;  %v505_v56 = vpack.c.bf16 %v494_v53, %v493_v55 }
  0xf5   : > { %v859_v30 = vpop.f32.mrf.mxu0 }
  0xf6   : > { %v495_v52 = vmax.f32 %v479_v44, 0.0  ;;  %v946_v30 = vld [vmem:[%s1276_s6] sm:$0xff]  }
  0xf7   : > { %v481_v32 = vpop.f32.mrf.mxu0 }
  0xf8   : > { %v482_v40 = vadd.f32 %v481_v32, %v395_v34 }
  0xf9   : > { %v860_v33 = vpop.f32.mrf.mxu0 }
  0xfa   : > { %v496_v49 = vmax.f32 %v482_v40, 0.0 }
  0xfb   : > { %v486_v35 = vpop.f32.mrf.mxu0 }
  0xfc   : > { %v487_v38 = vadd.f32 %v486_v35, %v400_v31  ;;  %v506_v54 = vpack.c.bf16 %v496_v49, %v495_v52  ;;  %v642_v31 = vpop.permute.xlu0 %641 }
  0xfd   : > { %v863_v37 = vpop.f32.mrf.mxu0 }
  0xfe   : > { %v497_v45 = vmax.f32 %v487_v38, 0.0  ;;  %v362_v37 = vld [vmem:[%s321_s21] sm:$0xff] }
  0xff   : > { %v489_v39 = vpop.f32.mrf.mxu0 }
 0x100   : > { %v490_v41 = vadd.f32 %v489_v39, %v405_v36  ;;  %v647_v36 = vpop.permute.xlu1 %646  ;;  %v363_v39 = vld [vmem:[%s321_s21 + $0x8] sm:$0xff] }
 0x101   : > { %v864_v43 = vpop.f32.mrf.mxu0 }
 0x102   : > { %v498_v46 = vmax.f32 %v490_v41, 0.0 }
 0x104   : > { %v507_v50 = vpack.c.bf16 %v498_v46, %v497_v45 }
 0x106   : > { %866 = vmatpush3.bf16.msra.mxu1 %v507_v50 }
 0x107   : > { %867 = vmatprep.subr.bf16.mxu1 %v1011_v2 }
 0x10a   : > { %868 = vmatpush3.bf16.msra.mxu1 %v506_v54 }
 0x10b   : > { %869 = vmatprep.subr.bf16.mxu1 %v1011_v2 }
 0x10e   : > { %870 = vmatpush3.bf16.msra.mxu1 %v505_v56 }
 0x111   : > { %872 = vmatmul.mubr.msk.bf16.vlgmr.msra.gmra.mxu1 %vm559_vm3, %v943_v57 }
 0x112   : > { %875 = vmatprep.mubr.msk.bf16.mxu1 %vm1012_vm0, %v1011_v2 }
 0x119   : > { %876 = vmatmul.mubr.msk.bf16.gmra.mxu1 %vm559_vm3, %v944_v58 }
 0x11a   : > { %879 = vmatprep.mubr.msk.bf16.mxu1 %vm1012_vm0, %v1011_v2 }
 0x121   : > { %880 = vmatmul.mubr.msk.bf16.gmra.mxu1 %vm559_vm3, %v945_v59 }
 0x1d1   : > { %v603_v60 = vpop.f32.mrf.mxu1 }
 0x1d2   : > { %v604_v24 = vadd.f32 %v603_v60, %v517_v23 }
 0x1d3   : > { %v873_v61 = vpop.f32.mrf.mxu1 }
 0x1d4   : > { %v626_v28 = vmax.f32 %v604_v24, 0.0 }
 0x1d5   : > { %v606_v62 = vpop.f32.mrf.mxu1 }
 0x1d6   : > { %v607_v20 = vadd.f32 %v606_v62, %v522_v19 }
 0x1d7   : > { %v874_v63 = vpop.f32.mrf.mxu1 }
 0x1d8   : > { %v627_v26 = vmax.f32 %v607_v20, 0.0 }
 0x1d9   : > { %v611_v0 = vpop.f32.mrf.mxu1 }
 0x1da   : > { %v612_v16 = vadd.f32 %v611_v0, %v527_v11  ;;  %v634_v29 = vpack.c.bf16 %v627_v26, %v626_v28 }
 0x1db   : > { %v877_v1 = vpop.f32.mrf.mxu1 }
 0x1dc   : > { %v628_v25 = vmax.f32 %v612_v16, 0.0 }
 0x1dd   : > { %v614_v4 = vpop.f32.mrf.mxu1 }
 0x1de   : > { %v615_v13 = vadd.f32 %v614_v4, %v532_v8 }
 0x1df   : > { %v878_v6 = vpop.f32.mrf.mxu1 }
 0x1e0   : > { %v629_v21 = vmax.f32 %v615_v13, 0.0 }
 0x1e1   : > { %v619_v7 = vpop.f32.mrf.mxu1 }
 0x1e2   : > { %v620_v10 = vadd.f32 %v619_v7, %v537_v5  ;;  %v635_v27 = vpack.c.bf16 %v629_v21, %v628_v25 }
 0x1e3   : > { %v881_v9 = vpop.f32.mrf.mxu1 }
 0x1e4   : > { %v630_v17 = vmax.f32 %v620_v10, 0.0 }
 0x1e5   : > { %v622_v12 = vpop.f32.mrf.mxu1 }
 0x1e6   : > { %v623_v14 = vadd.f32 %v622_v12, %v542_v3 }
 0x1e7   : > { %v882_v15 = vpop.f32.mrf.mxu1 }
 0x1e8   : > { %v631_v18 = vmax.f32 %v623_v14, 0.0 }
 0x1ea   : > { %v636_v22 = vpack.c.bf16 %v631_v18, %v630_v17 }
 0x1ec   : > { %884 = vmatpush3.bf16.msra.mxu0 %v636_v22 }
 0x1ed   : > { %885 = vmatprep.subr.bf16.mxu0 %v1011_v2 }
 0x1f0   : > { %886 = vmatpush3.bf16.msra.mxu0 %v635_v27 }
 0x1f1   : > { %887 = vmatprep.subr.bf16.mxu0 %v1011_v2 }
 0x1f4   : > { %888 = vmatpush3.bf16.msra.mxu0 %v634_v29 }
 0x1f7   : > { %890 = vmatmul.mubr.msk.bf16.vlgmr.msra.gmra.mxu0 %vm559_vm3, %v946_v30 }
 0x2b7   : > { %v691_v32 = vpop.f32.mrf.mxu0 }
 0x2b8   : > { %v692_v33 = vadd.f32 %v691_v32, %v642_v31 }
 0x2b9   : > { %v891_v34 = vpop.f32.mrf.mxu0 }
 0x2ba   : > { %v698_v35 = vmax.f32 %v692_v33, 0.0 }
 0x2bb   : > { %v694_v2 = vpop.f32.mrf.mxu0 }
 0x2bc   : > { %v695_v38 = vadd.f32 %v694_v2, %v647_v36  ;;  %v700_v41 = vmul.f32 %v698_v35, %v362_v37 }
 0x2bd   : > { %v892_v40 = vpop.f32.mrf.mxu0 }
 0x2be   : > { %v699_v42 = vmax.f32 %v695_v38, 0.0  ;;  %v702_v44 = vmax.f32 %v700_v41, 0.0 }
 0x2c0   : > { %v701_v43 = vmul.f32 %v699_v42, %v363_v39 }
 0x2c2   : > { %v703_v45 = vmax.f32 %v701_v43, 0.0 }
 0x2c4   : > { %v704_v46 = vadd.f32 %v703_v45, %v702_v44 }
 0x2c6   : > { %v705_v47 = vrot.slane %v704_v46, 4 }
 0x2c8   : > { %v706_v48 = vadd.f32 %v705_v47, %v704_v46 }
 0x2ca   : > { %v707_v49 = vrot.slane %v706_v48, 2 }
 0x2cc   : > { %v708_v50 = vadd.f32 %v707_v49, %v706_v48 }
 0x2ce   : > { %v709_v51 = vrot.slane %v708_v50, 1 }
 0x2d0   : > { %v710_v52 = vadd.f32 %v709_v51, %v708_v50 }
 0x2d2   : > { %v711_v53 = vadd.f32 1e-08, %v710_v52 }
 0x2d4   : > { %947 = vrcp.f32 %v711_v53 }
 0x2e1   : > { %v948_v54 = vpop.eup %947 }
 0x2e2   : > { %v714_v55 = vmul.f32 %v948_v54, %v703_v45  ;;  %v713_v56 = vmul.f32 %v948_v54, %v702_v44 }
 0x2e4   : > { %716 = vst [vmem:[%s355_s22 + $0x8] sm:$0xff] %v714_v55  ;;  %715 = vst [vmem:[%s355_s22] sm:$0xff] %v713_v56 }
 0x2e5   : > { %962 = shalt.err (!%p959_p7)
}
 0x2e6   : > { %s963_s19 = scalar_lea.hbm %s1225_s10, 256  ;;  %s967_s22 = scalar_lea.hbm %s1278_s8, 512 }
 0x2e7   : > { %p964_p10 = scmp.ne.s32.totalorder %s1225_s10, %s963_s19  ;;  %p968_p13 = scmp.lt.s32.totalorder %s1225_s10, %s1278_s8 }
 0x2e8   : > { %p969_p0 = scmp.lt.s32.totalorder %s967_s22, %s963_s19 }
 0x2e9   : > { %p965_p11 = pnand %p964_p10, %p1102_p6 }
 0x2ea   : > { %p970_p1 = por %p969_p0, %p968_p13 }
 0x2eb   : > { %p966_p12 = pneg %p965_p11 }
 0x2ed   : > { %p971_p2 = pnand %p970_p1, %p966_p12 }
 0x2ef   : > { %974 = shalt.err (!%p971_p2)
}
 0x2f0   : > { %s1015_s26 = smov 128   ;;  %s1016_s13 = smov 256  }
 0x2f1   : > { %s1017_s9 = smov 8  }
 0x2f2   : > { %893 = dma.vmem_to_hbm [thread:$0]  (%p1102_p6), %s1220_s23, 256, %s1225_s10, %s1229_s12, %s1015_s26, %s1016_s13, %s1017_s9  }
 0x2f3 PF: > { %s745_s17 = sand.u32 1, %s997_s27   ;;  %p896_p3 = pnand %p812_p9, %p1106_p8 }
 0x2f4   : > { %s746_s18 = scalar_lea.sflag [#allocation4], %s745_s17 }
 0x2f5   : > { %p897_p4 = pneg %p896_p3 }
 0x2f7   : > { %992 = dma.done.wait (%p897_p4), %s746_s18, 256  }
 0x2f8   : > { %994 = vsyncadd (%p897_p4), %s746_s18, 4294967040  ;;  %p18_p5 = scmp.ge.s32.totalorder %s1088_s11, 4   ;;  %s1281_s27 = smov %s1001_s28 }
 0x2f9   : > { %s1282_s28 = smov %s1005_s29  ;;  %s1283_s29 = smov %s1100_s14 }
 0x2fa   : > { %s1284_s30 = smov %s1088_s11  ;;  %20 = sbr.rel (!%p18_p5) target bundleno = 3 (0x3), region = 133 }
 0x2ff   :  { %751 = vsyncpa [#allocation4], 1 }
 0x300   :  { %753 = vsyncpa [#allocation4 + $0x1], 1 }

</bundles_post_ra>
